<compile_context>
chip_gen: v6e
topology: v6e:2x2x1
jax: 0.10.0
libtpu: 0.0.40
codegen_flags: <defaults>
</compile_context>

<pallas_src>
import jax
import jax.numpy as jnp
from jax.experimental import pallas as pl
from jax.experimental.pallas import tpu as pltpu


def se_kernel(x_ref, w1t_ref, w2t_ref, o_ref):
    # x_ref:   (Bt, HW, C)   channel axis on lanes
    # w1t_ref: (C, C//r)     fc1 weight, pre-transposed (h = pooled @ w1t)
    # w2t_ref: (C//r, C)     fc2 weight, pre-transposed (s = h @ w2t)
    # o_ref:   (Bt, HW, C)
    x = x_ref[...].astype(jnp.float32)                       # (Bt, HW, C)

    # ---- squeeze: global average pool over spatial (sublane reduce) ----
    pooled = jnp.mean(x, axis=1)                             # (Bt, C)

    # ---- excitation: fc1 -> relu -> fc2 -> sigmoid (lane-dense rows) ----
    h = jnp.dot(pooled, w1t_ref[...], preferred_element_type=jnp.float32)
    h = jnp.maximum(h, 0.0)                                  # (Bt, C//r)
    s = jnp.dot(h, w2t_ref[...], preferred_element_type=jnp.float32)
    s = jax.nn.sigmoid(s)                                    # (Bt, C)

    # ---- scale: per-channel gate broadcast over spatial (sublane bcast) ----
    # Single lane-dense store of the output tile; compute stays in f32 and is
    # cast only at the store (cheap on all gens, required on v5e for bf16 IO).
    o_ref[...] = (x * s[:, None, :]).astype(o_ref.dtype)


def _pick_bt(B, bytes_per_image, tile_budget_bytes):
    """Largest Bt dividing B such that 2x(in+out) tiles fit the budget."""
    bt = max(1, min(B, tile_budget_bytes // max(1, 4 * bytes_per_image)))
    while B % bt != 0:
        bt -= 1
    return bt


def se_block_pallas(x_nchw, w1, w2):
    """x_nchw: [B, C, H, W]; w1: [C//r, C] (fc1 weight); w2: [C, C//r] (fc2)."""
    B, C, H, W = x_nchw.shape
    HW = H * W
    dtype = x_nchw.dtype
    itemsize = jnp.dtype(dtype).itemsize

    # Layout plumbing (free): NCHW -> [B, HW, C] so C sits on lanes.
    x = jnp.transpose(x_nchw, (0, 2, 3, 1)).reshape(B, HW, C)
    w1t = w1.T   # (C, C//r)
    w2t = w2.T   # (C//r, C)

    # Batch Bt images per grid step.  Keep the double-buffered (in + out)
    # tiles under a conservative budget that also fits v7x's 64 MiB VMEM.
    tile_budget = 24 * 1024 * 1024
    bytes_per_image = HW * C * itemsize
    Bt = _pick_bt(B, bytes_per_image, tile_budget)
    # TODO(synk): if a single image's C*HW tile ever exceeds the VMEM budget,
    # switch to a two-phase (pool pass with accumulator, then scale pass)
    # spatially-tiled structure instead of shrinking C.

    w_bytes = (w1t.size + w2t.size) * jnp.dtype(w1t.dtype).itemsize
    vmem_limit = int(
        min(
            100 * 1024 * 1024,
            max(
                16 * 1024 * 1024,
                4 * Bt * bytes_per_image + 2 * w_bytes + (4 << 20),
            ),
        )
    )

    out = pl.pallas_call(
        se_kernel,
        out_shape=jax.ShapeDtypeStruct((B, HW, C), dtype),
        grid=(B // Bt,),
        in_specs=[
            pl.BlockSpec((Bt, HW, C), lambda b: (b, 0, 0)),
            pl.BlockSpec((w1t.shape[0], w1t.shape[1]), lambda b: (0, 0)),
            pl.BlockSpec((w2t.shape[0], w2t.shape[1]), lambda b: (0, 0)),
        ],
        out_specs=pl.BlockSpec((Bt, HW, C), lambda b: (b, 0, 0)),
        compiler_params=pltpu.CompilerParams(
            dimension_semantics=("parallel",),
            vmem_limit_bytes=vmem_limit,
        ),
    )(x, w1t, w2t)

    # Back to NCHW for the PyTorch-compatible return layout.
    return jnp.transpose(out.reshape(B, H, W, C), (0, 3, 1, 2))


def se_block_ref(x_nchw, w1, w2):
    """Pure-JAX reference mirroring the PyTorch forward."""
    pooled = jnp.mean(x_nchw, axis=(2, 3))                   # (B, C)
    h = jnp.maximum(pooled @ w1.T, 0.0)                      # (B, C//r)
    s = jax.nn.sigmoid(h @ w2.T)                             # (B, C)
    return x_nchw * s[:, :, None, None]


if __name__ == "__main__":
    key = jax.random.PRNGKey(0)
    k_x, k_w1, k_w2 = jax.random.split(key, 3)

    B, C, H, W = 2, 8, 16, 16
    ratio = 4
    Cr = C // ratio

    x = jax.random.normal(k_x, (B, C, H, W), dtype=jnp.float32)
    # Deterministic synthetic weights (nn.Linear(..., bias=False) shapes).
    w1 = jax.random.normal(k_w1, (Cr, C), dtype=jnp.float32) * 0.1   # fc1
    w2 = jax.random.normal(k_w2, (C, Cr), dtype=jnp.float32) * 0.1   # fc2

    out = se_block_pallas(x, w1, w2)
    out = jax.block_until_ready(out)

    ref = se_block_ref(x, w1, w2)
    assert out.shape == (B, C, H, W)
    assert jnp.allclose(out, ref, atol=1e-5, rtol=1e-5)

    print("KERNEL_OK")
</pallas_src>

<mosaic_0001>
module attributes {stable_mosaic.version = 11 : i64} {
  func.func @se_kernel(%arg0: i32, %arg1: memref<2x256x8xf32, #tpu.memory_space<vmem>>, %arg2: memref<8x2xf32, #tpu.memory_space<vmem>>, %arg3: memref<2x8xf32, #tpu.memory_space<vmem>>, %arg4: memref<2x256x8xf32, #tpu.memory_space<vmem>>) attributes {dimension_semantics = [#tpu.dimension_semantics<parallel>], iteration_bounds = array<i64: 1>, scalar_prefetch = 0 : i64, scratch_operands = 0 : i64, tpu.core_type = #tpu.core_type<tc>, window_params = [{transform_indices = @transform_0, window_bounds = array<i64: 2, 256, 8>}, {pipeline_mode = #tpu.pipeline_mode<synchronous>, transform_indices = @transform_1, window_bounds = array<i64: 8, 2>}, {pipeline_mode = #tpu.pipeline_mode<synchronous>, transform_indices = @transform_2, window_bounds = array<i64: 2, 8>}, {transform_indices = @transform_3, window_bounds = array<i64: 2, 256, 8>}]} {
    %c0 = arith.constant 0 : index
    %c0_0 = arith.constant 0 : index
    %c0_1 = arith.constant 0 : index
    %0 = vector.load %arg1[%c0, %c0_0, %c0_1] : memref<2x256x8xf32, #tpu.memory_space<vmem>>, vector<2x256x8xf32>
    %cst = arith.constant dense<0.000000e+00> : vector<2x8xf32>
    %1 = vector.multi_reduction <add>, %0, %cst [1] : vector<2x256x8xf32> to vector<2x8xf32>
    %cst_2 = arith.constant 2.560000e+02 : f32
    %2 = vector.broadcast %cst_2 : f32 to vector<2x8xf32>
    %3 = arith.divf %1, %2 : vector<2x8xf32>
    %c0_3 = arith.constant 0 : index
    %c0_4 = arith.constant 0 : index
    %4 = vector.load %arg2[%c0_3, %c0_4] : memref<8x2xf32, #tpu.memory_space<vmem>>, vector<8x2xf32>
    %cst_5 = arith.constant dense<0.000000e+00> : vector<2x2xf32>
    %5 = tpu.matmul %3, %4, %cst_5 {dimension_numbers = #tpu.dot_dimension_numbers<[1], [0], [0], [1], [0, 0, 1, 1], [], []>} : vector<2x8xf32>, vector<8x2xf32>, vector<2x2xf32> -> vector<2x2xf32>
    %cst_6 = arith.constant 0.000000e+00 : f32
    %6 = vector.broadcast %cst_6 : f32 to vector<2x2xf32>
    %7 = arith.maximumf %5, %6 : vector<2x2xf32>
    %c0_7 = arith.constant 0 : index
    %c0_8 = arith.constant 0 : index
    %8 = vector.load %arg3[%c0_7, %c0_8] : memref<2x8xf32, #tpu.memory_space<vmem>>, vector<2x8xf32>
    %cst_9 = arith.constant dense<0.000000e+00> : vector<2x8xf32>
    %9 = tpu.matmul %7, %8, %cst_9 {dimension_numbers = #tpu.dot_dimension_numbers<[1], [0], [0], [1], [0, 0, 1, 1], [], []>} : vector<2x2xf32>, vector<2x8xf32>, vector<2x8xf32> -> vector<2x8xf32>
    %10 = arith.negf %9 : vector<2x8xf32>
    %11 = math.exp %10 : vector<2x8xf32>
    %cst_10 = arith.constant 1.000000e+00 : f32
    %12 = vector.broadcast %cst_10 : f32 to vector<2x8xf32>
    %13 = arith.addf %12, %11 : vector<2x8xf32>
    %14 = arith.divf %12, %13 : vector<2x8xf32>
    %15 = vector.shape_cast %14 : vector<2x8xf32> to vector<2x1x8xf32>
    %16 = vector.broadcast %15 : vector<2x1x8xf32> to vector<2x256x8xf32>
    %17 = arith.mulf %0, %16 : vector<2x256x8xf32>
    %c0_11 = arith.constant 0 : index
    %c0_12 = arith.constant 0 : index
    %c0_13 = arith.constant 0 : index
    %18 = vector.load %arg4[%c0_11, %c0_12, %c0_13] : memref<2x256x8xf32, #tpu.memory_space<vmem>>, vector<2x256x8xf32>
    tpu.vector_store %arg4[%c0_11, %c0_12, %c0_13], %17 {strides = array<i32>} : memref<2x256x8xf32, #tpu.memory_space<vmem>>, vector<2x256x8xf32>,
    return
  }
  func.func @transform_0(%arg0: i32) -> (i32, i32, i32) {
    %c0_i32 = arith.constant 0 : i32
    %c0_i32_0 = arith.constant 0 : i32
    %c0_i32_1 = arith.constant 0 : i32
    return %arg0, %c0_i32, %c0_i32_0 : i32, i32, i32
  }
  func.func @transform_1(%arg0: i32) -> (i32, i32) {
    %c0_i32 = arith.constant 0 : i32
    %c0_i32_0 = arith.constant 0 : i32
    %c0_i32_1 = arith.constant 0 : i32
    return %c0_i32, %c0_i32_0 : i32, i32
  }
  func.func @transform_2(%arg0: i32) -> (i32, i32) {
    %c0_i32 = arith.constant 0 : i32
    %c0_i32_0 = arith.constant 0 : i32
    %c0_i32_1 = arith.constant 0 : i32
    return %c0_i32, %c0_i32_0 : i32, i32
  }
  func.func @transform_3(%arg0: i32) -> (i32, i32, i32) {
    %c0_i32 = arith.constant 0 : i32
    %c0_i32_0 = arith.constant 0 : i32
    %c0_i32_1 = arith.constant 0 : i32
    return %arg0, %c0_i32, %c0_i32_0 : i32, i32, i32
  }
}

</mosaic_0001>

<bundles_post_ra>
// kernel: tpu_custom_call.1
= control target key start
LH: loop header
LB: loop body
LE: loop exit
PB: predicated region body
PF: predicated region fallthrough
CT: control target
= control target key end

     0   :  { %vm78_vm0 = vcmask 64512   ;;  %v573_v0 = vmov 0.0   ;;  %vm574_vm1 = vmmov 0   ;;  %vm223_vm2 = vcmask 1041409   ;;  %s1405_s1 = inlined_call_operand.vmem [shape: f32[8,2], index: 1, kind: input, shape index: {}]   ;;  %s1406_s0 = inlined_call_operand.vmem [shape: f32[2,256,8], index: 0, kind: input, shape index: {}]   ;;  %s1407_s2 = inlined_call_operand.vmem [shape: f32[2,8], index: 2, kind: input, shape index: {}]   ;;  %s1408_s3 = inlined_call_operand.vmem [shape: f32[2,256,8], index: 3, kind: output, shape index: {}]  }
   0x1   :  { %556 = vmatprep.subr.mxu0 %v573_v0  ;;  %v220_v1 = vld [vmem:[%s1405_s1] sm:$0xff]  ;;  %558 = vmatprep.mubr.msk.f32.mxu0 %vm574_vm1, %v573_v0  ;;  %v607_v3 = vld [vmem:[%s1406_s0 + $0x8] sm:$0xff]  ;;  %v612_v4 = vld [vmem:[%s1406_s0 + $0x10] sm:$0xff]  ;;  %vm303_vm3 = vcmask 1041408   ;;  %vm299_vm4 = vcmask 15360  }
   0x2   :  { %v602_v2 = vld [vmem:[%s1406_s0] sm:$0xff]  ;;  %557 = vmatpush3.msra.mxu0 %v220_v1  ;;  %v617_v5 = vld [vmem:[%s1406_s0 + $0x18] sm:$0xff]  ;;  %v80_v7 = vsel %vm78_vm0, %v607_v3, 0.0  ;;  %561 = vmatprep.subr.mxu1 %v573_v0  ;;  %v82_v10 = vsel %vm78_vm0, %v612_v4, 0.0  ;;  %v635_v12 = vld [vmem:[%s1406_s0 + $0x28] sm:$0xff] }
   0x3   :  { %v79_v6 = vsel %vm78_vm0, %v602_v2, 0.0  ;;  %v626_v8 = vld [vmem:[%s1406_s0 + $0x20] sm:$0xff]  ;;  %563 = vmatprep.mubr.msk.f32.mxu1 %vm574_vm1, %v573_v0  ;;  %v84_v11 = vsel %vm78_vm0, %v617_v5, 0.0  ;;  %v642_v15 = vld [vmem:[%s1406_s0 + $0x30] sm:$0xff]  ;;  %v88_v17 = vsel %vm78_vm0, %v635_v12, 0.0  ;;  %v649_v18 = vld [vmem:[%s1406_s0 + $0x38] sm:$0xff] }
   0x4   :  { %v81_v9 = vadd.f32 %v80_v7, %v79_v6  ;;  %v86_v14 = vsel %vm78_vm0, %v626_v8, 0.0  ;;  %v90_v20 = vsel %vm78_vm0, %v642_v15, 0.0  ;;  %v656_v21 = vld [vmem:[%s1406_s0 + $0x40] sm:$0xff]  ;;  %v666_v24 = vld [vmem:[%s1406_s0 + $0x108] sm:$0xff]  ;;  %v671_v25 = vld [vmem:[%s1406_s0 + $0x110] sm:$0xff]  ;;  %v92_v26 = vsel %vm78_vm0, %v649_v18, 0.0 }
   0x5   :  { %v661_v23 = vld [vmem:[%s1406_s0 + $0x100] sm:$0xff]  ;;  %v678_v27 = vld [vmem:[%s1406_s0 + $0x48] sm:$0xff]  ;;  %v683_v28 = vld [vmem:[%s1406_s0 + $0x118] sm:$0xff]  ;;  %v149_v31 = vsel %vm78_vm0, %v666_v24, 0.0  ;;  %v151_v32 = vsel %vm78_vm0, %v671_v25, 0.0  ;;  %v94_v34 = vsel %vm78_vm0, %v656_v21, 0.0 }
   0x6   :  { %v83_v13 = vadd.f32 %v82_v10, %v81_v9  ;;  %v148_v30 = vsel %vm78_vm0, %v661_v23, 0.0  ;;  %v694_v33 = vld [vmem:[%s1406_s0 + $0x120] sm:$0xff]  ;;  %v701_v36 = vld [vmem:[%s1406_s0 + $0x50] sm:$0xff]  ;;  %v153_v38 = vsel %vm78_vm0, %v683_v28, 0.0  ;;  %v708_v39 = vld [vmem:[%s1406_s0 + $0x128] sm:$0xff]  ;;  %v96_v40 = vsel %vm78_vm0, %v678_v27, 0.0 }
   0x7   :  { %v150_v35 = vadd.f32 %v149_v31, %v148_v30  ;;  %v715_v42 = vld [vmem:[%s1406_s0 + $0x58] sm:$0xff]  ;;  %v155_v44 = vsel %vm78_vm0, %v694_v33, 0.0  ;;  %v722_v45 = vld [vmem:[%s1406_s0 + $0x130] sm:$0xff]  ;;  %v98_v46 = vsel %vm78_vm0, %v701_v36, 0.0  ;;  %v729_v48 = vld [vmem:[%s1406_s0 + $0x60] sm:$0xff]  ;;  %v157_v50 = vsel %vm78_vm0, %v708_v39, 0.0 }
   0x8   :  { %v85_v16 = vadd.f32 %v84_v11, %v83_v13  ;;  %v736_v51 = vld [vmem:[%s1406_s0 + $0x138] sm:$0xff]  ;;  %v100_v52 = vsel %vm78_vm0, %v715_v42, 0.0  ;;  %v743_v54 = vld [vmem:[%s1406_s0 + $0x68] sm:$0xff]  ;;  %v159_v56 = vsel %vm78_vm0, %v722_v45, 0.0  ;;  %v750_v57 = vld [vmem:[%s1406_s0 + $0x140] sm:$0xff]  ;;  %v102_v58 = vsel %vm78_vm0, %v729_v48, 0.0 }
   0x9   :  { %v152_v41 = vadd.f32 %v151_v32, %v150_v35  ;;  %v757_v60 = vld [vmem:[%s1406_s0 + $0x70] sm:$0xff]  ;;  %v161_v62 = vsel %vm78_vm0, %v736_v51, 0.0  ;;  %v764_v63 = vld [vmem:[%s1406_s0 + $0x148] sm:$0xff]  ;;  %v104_v0 = vsel %vm78_vm0, %v743_v54, 0.0  ;;  %v771_v6 = vld [vmem:[%s1406_s0 + $0x78] sm:$0xff]  ;;  %v163_v9 = vsel %vm78_vm0, %v750_v57, 0.0 }
   0xa   :  { %v87_v19 = vadd.f32 %v86_v14, %v85_v16  ;;  %v778_v10 = vld [vmem:[%s1406_s0 + $0x150] sm:$0xff]  ;;  %v106_v11 = vsel %vm78_vm0, %v757_v60, 0.0  ;;  %v785_v14 = vld [vmem:[%s1406_s0 + $0x80] sm:$0xff] }
   0xb   :  { %v154_v47 = vadd.f32 %v153_v38, %v152_v41  ;;  %1430 = vst [vmem:[#allocation2_spill] sm:$0xff] %v778_v10  ;;  %v167_v30 = vsel %vm78_vm0, %v778_v10, 0.0  ;;  %v806_v31 = vld [vmem:[%s1406_s0 + $0x160] sm:$0xff]  ;;  %v110_v32 = vsel %vm78_vm0, %v785_v14, 0.0  ;;  %v813_v35 = vld [vmem:[%s1406_s0 + $0x90] sm:$0xff] }
   0xc   :  { %v89_v22 = vadd.f32 %v88_v17, %v87_v19  ;;  %v165_v17 = vsel %vm78_vm0, %v764_v63, 0.0  ;;  %v792_v19 = vld [vmem:[%s1406_s0 + $0x158] sm:$0xff]  ;;  %1432 = vst [vmem:[#allocation4_spill] sm:$0xff] %v806_v31 }
   0xd   :  { %v156_v53 = vadd.f32 %v155_v44, %v154_v47  ;;  %1431 = vst [vmem:[#allocation3_spill] sm:$0xff] %v792_v19  ;;  %v169_v38 = vsel %vm78_vm0, %v792_v19, 0.0  ;;  %v827_v44 = vld [vmem:[%s1406_s0 + $0x98] sm:$0xff]  ;;  %v171_v47 = vsel %vm78_vm0, %v806_v31, 0.0 }
   0xe   :  { %v91_v29 = vadd.f32 %v90_v20, %v89_v22  ;;  %v108_v20 = vsel %vm78_vm0, %v771_v6, 0.0 }
   0xf   :  { %v158_v59 = vadd.f32 %v157_v50, %v156_v53  ;;  %v114_v50 = vsel %vm78_vm0, %v813_v35, 0.0  ;;  %v841_v53 = vld [vmem:[%s1406_s0 + $0xa0] sm:$0xff] }
  0x10   :  { %v93_v37 = vadd.f32 %v92_v26, %v91_v29  ;;  %v799_v26 = vld [vmem:[%s1406_s0 + $0x88] sm:$0xff] }
  0x11   :  { %v160_v1 = vadd.f32 %v159_v56, %v158_v59  ;;  %v112_v41 = vsel %vm78_vm0, %v799_v26, 0.0  ;;  %v116_v59 = vsel %vm78_vm0, %v827_v44, 0.0 }
  0x12   :  { %v95_v43 = vadd.f32 %v94_v34, %v93_v37 }
  0x13   :  { %v162_v13 = vadd.f32 %v161_v62, %v160_v1  ;;  %v855_v62 = vld [vmem:[%s1406_s0 + $0xa8] sm:$0xff] }
  0x14   :  { %v97_v49 = vadd.f32 %v96_v40, %v95_v43  ;;  %v820_v40 = vld [vmem:[%s1406_s0 + $0x168] sm:$0xff] }
  0x15   :  { %v164_v22 = vadd.f32 %v163_v9, %v162_v13  ;;  %1433 = vst [vmem:[#allocation5_spill] sm:$0xff] %v820_v40  ;;  %v173_v56 = vsel %vm78_vm0, %v820_v40, 0.0  ;;  %v118_v9 = vsel %vm78_vm0, %v841_v53, 0.0  ;;  %v869_v13 = vld [vmem:[%s1406_s0 + $0xb0] sm:$0xff] }
  0x16   :  { %v99_v55 = vadd.f32 %v98_v46, %v97_v49  ;;  %v834_v49 = vld [vmem:[%s1406_s0 + $0x170] sm:$0xff] }
  0x17   :  { %v166_v34 = vadd.f32 %v165_v17, %v164_v22  ;;  %1434 = vst [vmem:[#allocation6_spill] sm:$0xff] %v834_v49  ;;  %v175_v1 = vsel %vm78_vm0, %v834_v49, 0.0  ;;  %v120_v22 = vsel %vm78_vm0, %v855_v62, 0.0 }
  0x18   :  { %v101_v61 = vadd.f32 %v100_v52, %v99_v55 }
  0x19   :  { %v168_v43 = vadd.f32 %v167_v30, %v166_v34  ;;  %v883_v30 = vld [vmem:[%s1406_s0 + $0xb8] sm:$0xff] }
  0x1a   :  { %v103_v7 = vadd.f32 %v102_v58, %v101_v61  ;;  %v848_v58 = vld [vmem:[%s1406_s0 + $0x178] sm:$0xff] }
  0x1b   :  { %v170_v52 = vadd.f32 %v169_v38, %v168_v43  ;;  %1435 = vst [vmem:[#allocation7_spill] sm:$0xff] %v848_v58  ;;  %v177_v17 = vsel %vm78_vm0, %v848_v58, 0.0  ;;  %v122_v38 = vsel %vm78_vm0, %v869_v13, 0.0  ;;  %v897_v43 = vld [vmem:[%s1406_s0 + $0xc0] sm:$0xff] }
  0x1c   :  { %v105_v16 = vadd.f32 %v104_v0, %v103_v7  ;;  %v862_v7 = vld [vmem:[%s1406_s0 + $0x180] sm:$0xff] }
  0x1d   :  { %v172_v61 = vadd.f32 %v171_v47, %v170_v52  ;;  %1436 = vst [vmem:[#allocation8_spill] sm:$0xff] %v862_v7  ;;  %v179_v34 = vsel %vm78_vm0, %v862_v7, 0.0  ;;  %v124_v52 = vsel %vm78_vm0, %v883_v30, 0.0 }
  0x1e   :  { %v107_v29 = vadd.f32 %v106_v11, %v105_v16 }
  0x1f   :  { %v174_v11 = vadd.f32 %v173_v56, %v172_v61  ;;  %v911_v56 = vld [vmem:[%s1406_s0 + $0xc8] sm:$0xff] }
  0x20   :  { %v109_v37 = vadd.f32 %v108_v20, %v107_v29  ;;  %v876_v20 = vld [vmem:[%s1406_s0 + $0x188] sm:$0xff] }
  0x21   :  { %1437 = vst [vmem:[#allocation9_spill] sm:$0xff] %v876_v20  ;;  %v176_v29 = vadd.f32 %v175_v1, %v174_v11  ;;  %v181_v47 = vsel %vm78_vm0, %v876_v20, 0.0  ;;  %v126_v1 = vsel %vm78_vm0, %v897_v43, 0.0  ;;  %v925_v11 = vld [vmem:[%s1406_s0 + $0xd0] sm:$0xff] }
  0x22   :  { %v111_v46 = vadd.f32 %v110_v32, %v109_v37  ;;  %v890_v37 = vld [vmem:[%s1406_s0 + $0x190] sm:$0xff] }
  0x23   :  { %1438 = vst [vmem:[#allocation10_spill] sm:$0xff] %v890_v37  ;;  %v183_v61 = vsel %vm78_vm0, %v890_v37, 0.0 }
  0x24   :  { %v113_v55 = vadd.f32 %v112_v41, %v111_v46  ;;  %v178_v41 = vadd.f32 %v177_v17, %v176_v29  ;;  %v128_v29 = vsel %vm78_vm0, %v911_v56, 0.0 }
  0x26   :  { %v115_v0 = vadd.f32 %v114_v50, %v113_v55  ;;  %v904_v50 = vld [vmem:[%s1406_s0 + $0x198] sm:$0xff]  ;;  %v180_v55 = vadd.f32 %v179_v34, %v178_v41 }
  0x27   :  { %1439 = vst [vmem:[#allocation11_spill] sm:$0xff] %v904_v50  ;;  %v185_v17 = vsel %vm78_vm0, %v904_v50, 0.0  ;;  %v939_v34 = vld [vmem:[%s1406_s0 + $0xd8] sm:$0xff] }
  0x28   :  { %v117_v16 = vadd.f32 %v116_v59, %v115_v0  ;;  %v918_v0 = vld [vmem:[%s1406_s0 + $0x1a0] sm:$0xff] }
  0x29   :  { %1440 = vst [vmem:[#allocation12_spill] sm:$0xff] %v918_v0  ;;  %v187_v41 = vsel %vm78_vm0, %v918_v0, 0.0 }
  0x2a   :  { %v119_v32 = vadd.f32 %v118_v9, %v117_v16  ;;  %v182_v9 = vadd.f32 %v181_v47, %v180_v55  ;;  %v130_v47 = vsel %vm78_vm0, %v925_v11, 0.0  ;;  %v953_v55 = vld [vmem:[%s1406_s0 + $0xe0] sm:$0xff] }
  0x2c   :  { %v121_v46 = vadd.f32 %v120_v22, %v119_v32  ;;  %v932_v22 = vld [vmem:[%s1406_s0 + $0x1a8] sm:$0xff]  ;;  %v184_v32 = vadd.f32 %v183_v61, %v182_v9  ;;  %v132_v9 = vsel %vm78_vm0, %v939_v34, 0.0 }
  0x2d   :  { %1441 = vst [vmem:[#allocation13_spill] sm:$0xff] %v932_v22  ;;  %v189_v61 = vsel %vm78_vm0, %v932_v22, 0.0  ;;  %v134_v22 = vsel %vm78_vm0, %v953_v55, 0.0 }
  0x2e   :  { %v123_v59 = vadd.f32 %v122_v38, %v121_v46  ;;  %v946_v46 = vld [vmem:[%s1406_s0 + $0x1b0] sm:$0xff] }
  0x2f   :  { %1442 = vst [vmem:[#allocation14_spill] sm:$0xff] %v946_v46 }
  0x30   :  { %v125_v16 = vadd.f32 %v124_v52, %v123_v59  ;;  %v186_v52 = vadd.f32 %v185_v17, %v184_v32  ;;  %v967_v17 = vld [vmem:[%s1406_s0 + $0xe8] sm:$0xff] }
  0x32   :  { %v127_v38 = vadd.f32 %v126_v1, %v125_v16  ;;  %v960_v1 = vld [vmem:[%s1406_s0 + $0x1b8] sm:$0xff]  ;;  %v188_v16 = vadd.f32 %v187_v41, %v186_v52  ;;  %v981_v41 = vld [vmem:[%s1406_s0 + $0xf0] sm:$0xff] }
  0x33   :  { %1443 = vst [vmem:[#allocation15_spill] sm:$0xff] %v960_v1 }
  0x34   :  { %v129_v59 = vadd.f32 %v128_v29, %v127_v38  ;;  %v191_v29 = vsel %vm78_vm0, %v946_v46, 0.0  ;;  %v974_v38 = vld [vmem:[%s1406_s0 + $0x1c0] sm:$0xff]  ;;  %v190_v0 = vadd.f32 %v189_v61, %v188_v16  ;;  %v136_v46 = vsel %vm78_vm0, %v967_v17, 0.0  ;;  %v995_v61 = vld [vmem:[%s1406_s0 + $0xf8] sm:$0xff] }
  0x35   :  { %1444 = vst [vmem:[#allocation16_spill] sm:$0xff] %v974_v38 }
  0x36   :  { %v131_v32 = vadd.f32 %v130_v47, %v129_v59  ;;  %v193_v47 = vsel %vm78_vm0, %v960_v1, 0.0  ;;  %v988_v59 = vld [vmem:[%s1406_s0 + $0x1c8] sm:$0xff]  ;;  %v192_v50 = vadd.f32 %v191_v29, %v190_v0  ;;  %v138_v1 = vsel %vm78_vm0, %v981_v41, 0.0 }
  0x37   :  { %1445 = vst [vmem:[#allocation17_spill] sm:$0xff] %v988_v59  ;;  %v197_v0 = vsel %vm78_vm0, %v988_v59, 0.0  ;;  %v140_v29 = vsel %vm78_vm0, %v995_v61, 0.0  ;;  %v1027_v59 = vld [vmem:[%s1406_s0 + $0x1e8] sm:$0xff] }
  0x38   :  { %v133_v52 = vadd.f32 %v132_v9, %v131_v32  ;;  %v195_v9 = vsel %vm78_vm0, %v974_v38, 0.0  ;;  %v1002_v32 = vld [vmem:[%s1406_s0 + $0x1d0] sm:$0xff]  ;;  %v194_v37 = vadd.f32 %v193_v47, %v192_v50  ;;  %v1020_v50 = vld [vmem:[%s1406_s0 + $0x1e0] sm:$0xff]  ;;  %1449 = vst [vmem:[#allocation21_spill] sm:$0xff] %v1027_v59 }
  0x39   :  { %1446 = vst [vmem:[#allocation18_spill] sm:$0xff] %v1002_v32  ;;  %v199_v7 = vsel %vm78_vm0, %v1002_v32, 0.0  ;;  %1448 = vst [vmem:[#allocation20_spill] sm:$0xff] %v1020_v50 }
  0x3a   :  { %v135_v16 = vadd.f32 %v134_v22, %v133_v52  ;;  %v1011_v22 = vld [vmem:[%s1406_s0 + $0x1d8] sm:$0xff]  ;;  %v196_v52 = vadd.f32 %v195_v9, %v194_v37  ;;  %v1034_v9 = vld [vmem:[%s1406_s0 + $0x1f0] sm:$0xff] }
  0x3b   :  { %1447 = vst [vmem:[#allocation19_spill] sm:$0xff] %v1011_v22  ;;  %1450 = vst [vmem:[#allocation22_spill] sm:$0xff] %v1034_v9 }
  0x3c   :  { %v137_v20 = vadd.f32 %v136_v46, %v135_v16  ;;  %v198_v46 = vadd.f32 %v197_v0, %v196_v52  ;;  %v201_v16 = vsel %vm78_vm0, %v1011_v22, 0.0  ;;  %v1041_v52 = vld [vmem:[%s1406_s0 + $0x1f8] sm:$0xff] }
  0x3d   :  { %v209_v32 = vsel %vm78_vm0, %v1041_v52, 0.0 }
  0x3e   :  { %v139_v38 = vadd.f32 %v138_v1, %v137_v20  ;;  %v200_v37 = vadd.f32 %v199_v7, %v198_v46  ;;  %v203_v1 = vsel %vm78_vm0, %v1020_v50, 0.0  ;;  %v207_v46 = vsel %vm78_vm0, %v1034_v9, 0.0 }
  0x40   :  { %v141_v47 = vadd.f32 %v140_v29, %v139_v38  ;;  %v202_v0 = vadd.f32 %v201_v16, %v200_v37  ;;  %v205_v29 = vsel %vm78_vm0, %v1027_v59, 0.0 }
  0x42   :  { %v142_v20 = vrot.slane %v141_v47, 4  ;;  %v204_v7 = vadd.f32 %v203_v1, %v202_v0 }
  0x44   :  { %v143_v38 = vadd.f32 %v142_v20, %v141_v47  ;;  %v206_v22 = vadd.f32 %v205_v29, %v204_v7 }
  0x46   :  { %v144_v50 = vrot.slane %v143_v38, 2  ;;  %v208_v58 = vadd.f32 %v207_v46, %v206_v22  ;;  %v298_v22 = vld [vmem:[%s1407_s2] sm:$0x3] }
  0x47   :  { %562 = vmatpush3.msk.msra.mxu1 %vm303_vm3, %v298_v22 }
  0x48   :  { %v145_v16 = vadd.f32 %v144_v50, %v143_v38  ;;  %v210_v47 = vadd.f32 %v209_v32, %v208_v58  ;;  %v387_v38 = vlaneseq }
  0x4a   :  { %v211_v37 = vrot.slane %v210_v47, 4  ;;  %v146_v20 = vrot.slane %v145_v16, 1  ;;  %v388_v7 = vshrl.u32 %v387_v38, 7 }
  0x4c   :  { %v212_v59 = vadd.f32 %v211_v37, %v210_v47  ;;  %v147_v40 = vadd.f32 %v146_v20, %v145_v16  ;;  %v408_v37 = vsub.s32 0, %v388_v7 }
  0x4e   :  { %v213_v49 = vrot.slane %v212_v59, 2  ;;  %v218_v1 = vmul.f32 0.00390625, %v147_v40  ;;  %v575_v40 = vmov 1966171168  }
  0x50   :  { %v214_v31 = vadd.f32 %v213_v49, %v212_v59 }
  0x52   :  { %v215_v19 = vrot.slane %v214_v31, 1 }
  0x54   :  { %v216_v10 = vadd.f32 %v215_v19, %v214_v31 }
  0x56   :  { %v219_v0 = vmul.f32 0.00390625, %v216_v10 }
  0x58   :  { %v224_v9 = vsel %vm223_vm2, %v219_v0, %v218_v1 }
  0x59   :  { %559 = vmatmul.mubr.msk.f32.vlgmr.msra.gmra.mxu0 %vm78_vm0, %v224_v9  ;;  %v385_v9 = vunpack.c.l.s4 %v575_v40 }
  0x5b   :  { %v386_v29 = vunpack.c.0.s8 %v385_v9 }
  0x5d   :  { %v389_v46 = vsub.s32 %v386_v29, %v388_v7  ;;  %v1456_v29 = vld [vmem:[#allocation7_spill] sm:$0xff] }
 0x119   :  { %v293_v58 = vpop.f32.mrf.mxu0 }
 0x11a   :  { %v297_v32 = vmax.f32 %v293_v58, 0.0 }
 0x11b   :  { %v560_v50 = vpop.f32.mrf.mxu0 }
 0x11c   :  { %564 = vmatmul.mubr.msk.f32.vlgmr.msra.gmra.mxu1 %vm299_vm4, %v297_v32 }
 0x1dc   :  { %v373_v49 = vpop.f32.mrf.mxu1 }
 0x1dd   :  { %v551_v59 = vmul.f32 -1.442695, %v373_v49 }
 0x1de   :  { %v565_v19 = vpop.f32.mrf.mxu1 }
 0x1df   :  { %569 = vpow2.f32 %v551_v59 }
 0x1ec   :  { %v570_v31 = vpop.eup %569 }
 0x1ed   :  { %v380_v10 = vadd.f32 1.0, %v570_v31 }
 0x1ef   :  { %571 = vrcp.f32 %v380_v10 }
 0x1fc   :  { %v572_v16 = vpop.eup %571 }
 0x1fd   :  { %v390_v47 = vrot.slane %v572_v16, %v389_v46 }
 0x1ff   :  { %v391_v20 = vcombine.high %v390_v47, %v390_v47  ;;  %v398_v1 = vrot.slane %v390_v47, %v389_v46  ;;  %v1458_v47 = vld [vmem:[#allocation9_spill] sm:$0xff] }
 0x201   :  { %v405_v0 = vrot.slane %v391_v20, %v389_v46  ;;  %v409_v22 = vrot.slane %v398_v1, %v408_v37  ;;  %v1457_v46 = vld [vmem:[#allocation8_spill] sm:$0xff]  ;;  %v1459_v20 = vld [vmem:[#allocation10_spill] sm:$0xff] }
 0x203   :  { %v1051_v58 = vrot.slane %v405_v0, %v408_v37  ;;  %v416_v32 = vmul.f32 %v409_v22, %v602_v2  ;;  %v417_v50 = vmul.f32 %v409_v22, %v607_v3  ;;  %v418_v49 = vmul.f32 %v409_v22, %v612_v4  ;;  %v1460_v0 = vld [vmem:[#allocation11_spill] sm:$0xff] }
 0x204   :  { %v419_v59 = vmul.f32 %v409_v22, %v617_v5  ;;  %v420_v19 = vmul.f32 %v409_v22, %v626_v8  ;;  %v421_v31 = vmul.f32 %v409_v22, %v635_v12  ;;  %v422_v10 = vmul.f32 %v409_v22, %v642_v15 }
 0x205   :  { %v423_v40 = vmul.f32 %v409_v22, %v649_v18  ;;  %v424_v9 = vmul.f32 %v409_v22, %v656_v21  ;;  %v425_v38 = vmul.f32 %v409_v22, %v678_v27  ;;  %v426_v2 = vmul.f32 %v409_v22, %v701_v36  ;;  %480 = vst.msk [vmem:[%s1408_s3] sm:$0xff] %vm78_vm0, %v416_v32  ;;  %v1461_v32 = vld [vmem:[#allocation12_spill] sm:$0xff] }
 0x206   :  { %481 = vst.msk [vmem:[%s1408_s3 + $0x8] sm:$0xff] %vm78_vm0, %v417_v50  ;;  %482 = vst.msk [vmem:[%s1408_s3 + $0x10] sm:$0xff] %vm78_vm0, %v418_v49  ;;  %v427_v3 = vmul.f32 %v409_v22, %v715_v42  ;;  %v428_v4 = vmul.f32 %v409_v22, %v729_v48  ;;  %v429_v5 = vmul.f32 %v409_v22, %v743_v54  ;;  %v1462_v49 = vld [vmem:[#allocation13_spill] sm:$0xff] }
 0x207   :  { %v430_v8 = vmul.f32 %v409_v22, %v757_v60  ;;  %483 = vst.msk [vmem:[%s1408_s3 + $0x18] sm:$0xff] %vm78_vm0, %v419_v59  ;;  %484 = vst.msk [vmem:[%s1408_s3 + $0x20] sm:$0xff] %vm78_vm0, %v420_v19  ;;  %v431_v12 = vmul.f32 %v409_v22, %v771_v6  ;;  %v432_v15 = vmul.f32 %v409_v22, %v785_v14  ;;  %v1463_v19 = vld [vmem:[#allocation14_spill] sm:$0xff] }
 0x208   :  { %485 = vst.msk [vmem:[%s1408_s3 + $0x28] sm:$0xff] %vm78_vm0, %v421_v31  ;;  %486 = vst.msk [vmem:[%s1408_s3 + $0x30] sm:$0xff] %vm78_vm0, %v422_v10  ;;  %v433_v18 = vmul.f32 %v409_v22, %v799_v26  ;;  %v434_v21 = vmul.f32 %v409_v22, %v813_v35  ;;  %v435_v27 = vmul.f32 %v409_v22, %v827_v44  ;;  %v1464_v10 = vld [vmem:[#allocation15_spill] sm:$0xff] }
 0x209   :  { %487 = vst.msk [vmem:[%s1408_s3 + $0x38] sm:$0xff] %vm78_vm0, %v423_v40  ;;  %488 = vst.msk [vmem:[%s1408_s3 + $0x40] sm:$0xff] %vm78_vm0, %v424_v9  ;;  %v436_v36 = vmul.f32 %v409_v22, %v841_v53  ;;  %v437_v42 = vmul.f32 %v409_v22, %v855_v62  ;;  %v438_v48 = vmul.f32 %v409_v22, %v869_v13  ;;  %v1465_v9 = vld [vmem:[#allocation16_spill] sm:$0xff] }
 0x20a   :  { %489 = vst.msk [vmem:[%s1408_s3 + $0x48] sm:$0xff] %vm78_vm0, %v425_v38  ;;  %490 = vst.msk [vmem:[%s1408_s3 + $0x50] sm:$0xff] %vm78_vm0, %v426_v2  ;;  %v439_v54 = vmul.f32 %v409_v22, %v883_v30  ;;  %v440_v60 = vmul.f32 %v409_v22, %v897_v43  ;;  %v441_v6 = vmul.f32 %v409_v22, %v911_v56  ;;  %v1466_v2 = vld [vmem:[#allocation17_spill] sm:$0xff] }
 0x20b   :  { %491 = vst.msk [vmem:[%s1408_s3 + $0x58] sm:$0xff] %vm78_vm0, %v427_v3  ;;  %492 = vst.msk [vmem:[%s1408_s3 + $0x60] sm:$0xff] %vm78_vm0, %v428_v4  ;;  %v442_v14 = vmul.f32 %v409_v22, %v925_v11  ;;  %v443_v26 = vmul.f32 %v409_v22, %v939_v34  ;;  %v444_v35 = vmul.f32 %v409_v22, %v953_v55  ;;  %v1454_v55 = vld [vmem:[#allocation5_spill] sm:$0xff]  ;;  %v1467_v4 = vld [vmem:[#allocation18_spill] sm:$0xff] }
 0x20c   :  { %493 = vst.msk [vmem:[%s1408_s3 + $0x68] sm:$0xff] %vm78_vm0, %v429_v5  ;;  %494 = vst.msk [vmem:[%s1408_s3 + $0x70] sm:$0xff] %vm78_vm0, %v430_v8  ;;  %v445_v44 = vmul.f32 %v409_v22, %v967_v17  ;;  %v446_v53 = vmul.f32 %v409_v22, %v981_v41  ;;  %v447_v62 = vmul.f32 %v409_v22, %v995_v61  ;;  %v1455_v41 = vld [vmem:[#allocation6_spill] sm:$0xff]  ;;  %v1468_v8 = vld [vmem:[#allocation19_spill] sm:$0xff] }
 0x20d   :  { %495 = vst.msk [vmem:[%s1408_s3 + $0x78] sm:$0xff] %vm78_vm0, %v431_v12  ;;  %496 = vst.msk [vmem:[%s1408_s3 + $0x80] sm:$0xff] %vm78_vm0, %v432_v15  ;;  %v448_v13 = vmul.f32 %v1051_v58, %v661_v23  ;;  %v449_v30 = vmul.f32 %v1051_v58, %v666_v24  ;;  %v450_v43 = vmul.f32 %v1051_v58, %v671_v25  ;;  %v1469_v15 = vld [vmem:[#allocation20_spill] sm:$0xff] }
 0x20e   :  { %497 = vst.msk [vmem:[%s1408_s3 + $0x88] sm:$0xff] %vm78_vm0, %v433_v18  ;;  %498 = vst.msk [vmem:[%s1408_s3 + $0x90] sm:$0xff] %vm78_vm0, %v434_v21  ;;  %v451_v23 = vmul.f32 %v1051_v58, %v683_v28  ;;  %v452_v24 = vmul.f32 %v1051_v58, %v694_v33  ;;  %v453_v25 = vmul.f32 %v1051_v58, %v708_v39  ;;  %v1470_v21 = vld [vmem:[#allocation21_spill] sm:$0xff] }
 0x20f   :  { %499 = vst.msk [vmem:[%s1408_s3 + $0x98] sm:$0xff] %vm78_vm0, %v435_v27  ;;  %500 = vst.msk [vmem:[%s1408_s3 + $0xa0] sm:$0xff] %vm78_vm0, %v436_v36  ;;  %v454_v56 = vmul.f32 %v1051_v58, %v722_v45  ;;  %v455_v28 = vmul.f32 %v1051_v58, %v736_v51  ;;  %v456_v33 = vmul.f32 %v1051_v58, %v750_v57  ;;  %v1451_v45 = vld [vmem:[#allocation2_spill] sm:$0xff]  ;;  %v1452_v51 = vld [vmem:[#allocation3_spill] sm:$0xff] }
 0x210   :  { %501 = vst.msk [vmem:[%s1408_s3 + $0xa8] sm:$0xff] %vm78_vm0, %v437_v42  ;;  %502 = vst.msk [vmem:[%s1408_s3 + $0xb0] sm:$0xff] %vm78_vm0, %v438_v48  ;;  %v457_v39 = vmul.f32 %v1051_v58, %v764_v63  ;;  %v458_v11 = vmul.f32 %v1051_v58, %v1451_v45  ;;  %v459_v57 = vmul.f32 %v1051_v58, %v1452_v51  ;;  %v1453_v63 = vld [vmem:[#allocation4_spill] sm:$0xff]  ;;  %v1471_v36 = vld [vmem:[#allocation22_spill] sm:$0xff] }
 0x211   :  { %503 = vst.msk [vmem:[%s1408_s3 + $0xb8] sm:$0xff] %vm78_vm0, %v439_v54  ;;  %504 = vst.msk [vmem:[%s1408_s3 + $0xc0] sm:$0xff] %vm78_vm0, %v440_v60  ;;  %v460_v34 = vmul.f32 %v1051_v58, %v1453_v63  ;;  %v461_v17 = vmul.f32 %v1051_v58, %v1454_v55  ;;  %v462_v61 = vmul.f32 %v1051_v58, %v1455_v41 }
 0x212   :  { %505 = vst.msk [vmem:[%s1408_s3 + $0xc8] sm:$0xff] %vm78_vm0, %v441_v6  ;;  %506 = vst.msk [vmem:[%s1408_s3 + $0xd0] sm:$0xff] %vm78_vm0, %v442_v14  ;;  %v463_v7 = vmul.f32 %v1051_v58, %v1456_v29  ;;  %v464_v16 = vmul.f32 %v1051_v58, %v1457_v46  ;;  %v465_v37 = vmul.f32 %v1051_v58, %v1458_v47 }
 0x213   :  { %507 = vst.msk [vmem:[%s1408_s3 + $0xd8] sm:$0xff] %vm78_vm0, %v443_v26  ;;  %508 = vst.msk [vmem:[%s1408_s3 + $0xe0] sm:$0xff] %vm78_vm0, %v444_v35  ;;  %v466_v1 = vmul.f32 %v1051_v58, %v1459_v20  ;;  %v467_v22 = vmul.f32 %v1051_v58, %v1460_v0  ;;  %v468_v50 = vmul.f32 %v1051_v58, %v1461_v32 }
 0x214   :  { %509 = vst.msk [vmem:[%s1408_s3 + $0xe8] sm:$0xff] %vm78_vm0, %v445_v44  ;;  %510 = vst.msk [vmem:[%s1408_s3 + $0xf0] sm:$0xff] %vm78_vm0, %v446_v53  ;;  %v469_v59 = vmul.f32 %v1051_v58, %v1462_v49  ;;  %v470_v31 = vmul.f32 %v1051_v58, %v1463_v19  ;;  %v471_v40 = vmul.f32 %v1051_v58, %v1464_v10 }
 0x215   :  { %511 = vst.msk [vmem:[%s1408_s3 + $0xf8] sm:$0xff] %vm78_vm0, %v447_v62  ;;  %512 = vst.msk [vmem:[%s1408_s3 + $0x100] sm:$0xff] %vm78_vm0, %v448_v13  ;;  %v472_v38 = vmul.f32 %v1051_v58, %v1465_v9  ;;  %v473_v3 = vmul.f32 %v1051_v58, %v1466_v2  ;;  %v474_v5 = vmul.f32 %v1051_v58, %v1467_v4 }
 0x216   :  { %513 = vst.msk [vmem:[%s1408_s3 + $0x108] sm:$0xff] %vm78_vm0, %v449_v30  ;;  %514 = vst.msk [vmem:[%s1408_s3 + $0x110] sm:$0xff] %vm78_vm0, %v450_v43  ;;  %v475_v12 = vmul.f32 %v1051_v58, %v1468_v8  ;;  %v476_v18 = vmul.f32 %v1051_v58, %v1469_v15  ;;  %v477_v27 = vmul.f32 %v1051_v58, %v1470_v21 }
 0x217   :  { %515 = vst.msk [vmem:[%s1408_s3 + $0x118] sm:$0xff] %vm78_vm0, %v451_v23  ;;  %516 = vst.msk [vmem:[%s1408_s3 + $0x120] sm:$0xff] %vm78_vm0, %v452_v24  ;;  %v478_v42 = vmul.f32 %v1051_v58, %v1471_v36  ;;  %v479_v48 = vmul.f32 %v1051_v58, %v1041_v52 }
 0x218   :  { %517 = vst.msk [vmem:[%s1408_s3 + $0x128] sm:$0xff] %vm78_vm0, %v453_v25  ;;  %518 = vst.msk [vmem:[%s1408_s3 + $0x130] sm:$0xff] %vm78_vm0, %v454_v56 }
 0x219   :  { %519 = vst.msk [vmem:[%s1408_s3 + $0x138] sm:$0xff] %vm78_vm0, %v455_v28  ;;  %520 = vst.msk [vmem:[%s1408_s3 + $0x140] sm:$0xff] %vm78_vm0, %v456_v33 }
 0x21a   :  { %521 = vst.msk [vmem:[%s1408_s3 + $0x148] sm:$0xff] %vm78_vm0, %v457_v39  ;;  %522 = vst.msk [vmem:[%s1408_s3 + $0x150] sm:$0xff] %vm78_vm0, %v458_v11 }
 0x21b   :  { %523 = vst.msk [vmem:[%s1408_s3 + $0x158] sm:$0xff] %vm78_vm0, %v459_v57  ;;  %524 = vst.msk [vmem:[%s1408_s3 + $0x160] sm:$0xff] %vm78_vm0, %v460_v34 }
 0x21c   :  { %525 = vst.msk [vmem:[%s1408_s3 + $0x168] sm:$0xff] %vm78_vm0, %v461_v17  ;;  %526 = vst.msk [vmem:[%s1408_s3 + $0x170] sm:$0xff] %vm78_vm0, %v462_v61 }
 0x21d   :  { %527 = vst.msk [vmem:[%s1408_s3 + $0x178] sm:$0xff] %vm78_vm0, %v463_v7  ;;  %528 = vst.msk [vmem:[%s1408_s3 + $0x180] sm:$0xff] %vm78_vm0, %v464_v16 }
 0x21e   :  { %529 = vst.msk [vmem:[%s1408_s3 + $0x188] sm:$0xff] %vm78_vm0, %v465_v37  ;;  %530 = vst.msk [vmem:[%s1408_s3 + $0x190] sm:$0xff] %vm78_vm0, %v466_v1 }
 0x21f   :  { %531 = vst.msk [vmem:[%s1408_s3 + $0x198] sm:$0xff] %vm78_vm0, %v467_v22  ;;  %532 = vst.msk [vmem:[%s1408_s3 + $0x1a0] sm:$0xff] %vm78_vm0, %v468_v50 }
 0x220   :  { %533 = vst.msk [vmem:[%s1408_s3 + $0x1a8] sm:$0xff] %vm78_vm0, %v469_v59  ;;  %534 = vst.msk [vmem:[%s1408_s3 + $0x1b0] sm:$0xff] %vm78_vm0, %v470_v31 }
 0x221   :  { %535 = vst.msk [vmem:[%s1408_s3 + $0x1b8] sm:$0xff] %vm78_vm0, %v471_v40  ;;  %536 = vst.msk [vmem:[%s1408_s3 + $0x1c0] sm:$0xff] %vm78_vm0, %v472_v38 }
 0x222   :  { %537 = vst.msk [vmem:[%s1408_s3 + $0x1c8] sm:$0xff] %vm78_vm0, %v473_v3  ;;  %538 = vst.msk [vmem:[%s1408_s3 + $0x1d0] sm:$0xff] %vm78_vm0, %v474_v5 }
 0x223   :  { %539 = vst.msk [vmem:[%s1408_s3 + $0x1d8] sm:$0xff] %vm78_vm0, %v475_v12  ;;  %540 = vst.msk [vmem:[%s1408_s3 + $0x1e0] sm:$0xff] %vm78_vm0, %v476_v18 }
 0x224   :  { %541 = vst.msk [vmem:[%s1408_s3 + $0x1e8] sm:$0xff] %vm78_vm0, %v477_v27  ;;  %542 = vst.msk [vmem:[%s1408_s3 + $0x1f0] sm:$0xff] %vm78_vm0, %v478_v42 }
 0x225   :  { %543 = vst.msk [vmem:[%s1408_s3 + $0x1f8] sm:$0xff] %vm78_vm0, %v479_v48 }

</bundles_post_ra>
